<compile_context>
chip_gen: v7x
topology: tpu7x:2x2x1
jax: 0.10.0
libtpu: 0.0.40
codegen_flags: <defaults>
</compile_context>

<pallas_src>
import jax
import jax.numpy as jnp
from jax.experimental import pallas as pl
from jax.experimental.pallas import tpu as pltpu


# Row offsets inside the packed constant buffer (all multiples of 8 so the
# static slices below are (8,128)-tile aligned).
_O_W1 = 0      # fc1 weight   [6,   128]  rows   0..5
_O_W2 = 8      # fc2 weight   [128, 128]  rows   8..135
_O_W3 = 136    # fc3 weight   [16,  128]  rows 136..151
_O_B123 = 152  # b1+b2+b3     [1,   128]  row  152
_O_W45 = 160   # head weight  [128, 128]  rows 160..287 (cols 0..5 fc4, col 6 fc5)
_O_B45 = 288   # head bias    [1,   128]  row  288
_PACK_ROWS = 296  # padded to a multiple of 8


def _rcp(d):
    """EUP approx reciprocal + one Newton step (rel. err ~1e-7, well under 1e-5)."""
    r = pl.reciprocal(d, approx=True)
    return r * (2.0 - d * r)


def net_kernel(x1_ref, x2_ref, x3_ref, w_ref, out_ref):
    # h = fc1(x1) + fc2(x2) + fc3(x3)   -> [B, 128]
    h = (
        jnp.dot(x1_ref[...], w_ref[_O_W1:_O_W1 + 6, :],
                preferred_element_type=jnp.float32)
        + jnp.dot(x2_ref[...], w_ref[_O_W2:_O_W2 + 128, :],
                  preferred_element_type=jnp.float32)
        + jnp.dot(x3_ref[...], w_ref[_O_W3:_O_W3 + 16, :],
                  preferred_element_type=jnp.float32)
        + w_ref[_O_B123:_O_B123 + 1, :]            # broadcast (b1+b2+b3)
    )

    # Fused head: lanes 0..5 = fc4 logits, lane 6 = fc5 logit, rest = 0.
    l = jnp.dot(h, w_ref[_O_W45:_O_W45 + 128, :],
                preferred_element_type=jnp.float32) + w_ref[_O_B45:_O_B45 + 1, :]

    # Softmax over dim=0 (batch axis); each lane is independent, so computing
    # it on all 128 lanes at once is exact for the 6 real fc4 lanes.
    m = jnp.max(l, axis=0, keepdims=True)
    e = jnp.exp(l - m)
    soft = e * _rcp(jnp.sum(e, axis=0, keepdims=True))

    # Sigmoid (used for lane 6): 1 / (1 + exp(-l)) with EUP exp + refined rcp.
    sig = _rcp(1.0 + jnp.exp(-l))

    lane = jax.lax.broadcasted_iota(jnp.int32, l.shape, dimension=1)
    out_ref[...] = jnp.where(lane < 6, soft, sig).astype(out_ref.dtype)


@jax.jit
def net_forward(x1, x2, x3, w_packed):
    """Returns a single lane-dense [B,128] slab: lanes 0..5 = softmax(fc4(h),
    dim=0), lane 6 = sigmoid(fc5(h)).  Split at the consumer."""
    B = x1.shape[0]
    vmem = pl.BlockSpec(memory_space=pltpu.MemorySpace.VMEM)
    return pl.pallas_call(
        net_kernel,
        out_shape=jax.ShapeDtypeStruct((B, 128), jnp.float32),
        in_specs=[vmem, vmem, vmem, vmem],
        out_specs=vmem,
    )(x1, x2, x3, w_packed)


def init_linear(key, fan_in, fan_out):
    """PyTorch-style init U(-1/sqrt(fan_in), 1/sqrt(fan_in)).
    Weight stored transposed as [in, out]; bias stored as [1, out]."""
    kw, kb = jax.random.split(key)
    bound = 1.0 / jnp.sqrt(fan_in)
    w = jax.random.uniform(kw, (fan_in, fan_out), jnp.float32, -bound, bound)
    b = jax.random.uniform(kb, (1, fan_out), jnp.float32, -bound, bound)
    return w, b


def pack_params(params):
    """One-time packing of every constant into a single [296,128] f32 buffer
    (one DMA).  fc4/fc5 are padded into one lane-dense 128-wide head; fc1-3
    biases are pre-summed.  All segment starts are 8-sublane aligned."""
    (w1, b1), (w2, b2), (w3, b3), (w4, b4), (w5, b5) = params
    W = jnp.zeros((_PACK_ROWS, 128), jnp.float32)
    W = W.at[_O_W1:_O_W1 + 6, :].set(w1)
    W = W.at[_O_W2:_O_W2 + 128, :].set(w2)
    W = W.at[_O_W3:_O_W3 + 16, :].set(w3)
    W = W.at[_O_B123:_O_B123 + 1, :].set(b1 + b2 + b3)
    W = W.at[_O_W45:_O_W45 + 128, 0:6].set(w4)
    W = W.at[_O_W45:_O_W45 + 128, 6:7].set(w5)
    W = W.at[_O_B45:_O_B45 + 1, 0:6].set(b4)
    W = W.at[_O_B45:_O_B45 + 1, 6:7].set(b5)
    return W


def reference_forward(x1, x2, x3, params):
    (w1, b1), (w2, b2), (w3, b3), (w4, b4), (w5, b5) = params
    h = (x1 @ w1 + b1) + (x2 @ w2 + b2) + (x3 @ w3 + b3)
    out4 = jax.nn.softmax(h @ w4 + b4, axis=0)   # dim=0, as in nn.Softmax(dim=0)
    out5 = jax.nn.sigmoid(h @ w5 + b5)
    return out4, out5


if __name__ == "__main__":
    key = jax.random.PRNGKey(0)
    k_params, k_x1, k_x2, k_x3 = jax.random.split(key, 4)
    kp = jax.random.split(k_params, 5)

    params = (
        init_linear(kp[0], 6, 128),     # fc1
        init_linear(kp[1], 128, 128),   # fc2
        init_linear(kp[2], 16, 128),    # fc3
        init_linear(kp[3], 128, 6),     # fc4
        init_linear(kp[4], 128, 1),     # fc5
    )
    w_packed = pack_params(params)

    B = 8
    x1 = jax.random.normal(k_x1, (B, 6), jnp.float32)
    x2 = jax.random.normal(k_x2, (B, 128), jnp.float32)
    x3 = jax.random.normal(k_x3, (B, 16), jnp.float32)

    out = net_forward(x1, x2, x3, w_packed)
    jax.block_until_ready(out)

    # Consumer-side split (kept out of the jitted pallas wrapper per review).
    out4 = out[:, :6]    # softmax(fc4(h), dim=0)
    out5 = out[:, 6:7]   # sigmoid(fc5(h))

    ref4, ref5 = reference_forward(x1, x2, x3, params)
    assert out4.shape == (B, 6) and out5.shape == (B, 1)
    assert jnp.allclose(out4, ref4, atol=1e-5, rtol=1e-5)
    assert jnp.allclose(out5, ref5, atol=1e-5, rtol=1e-5)

    print("KERNEL_OK")
</pallas_src>

<mosaic_0001>
module attributes {stable_mosaic.version = 11 : i64} {
  func.func @net_kernel(%arg0: memref<8x6xf32, #tpu.memory_space<vmem>>, %arg1: memref<8x128xf32, #tpu.memory_space<vmem>>, %arg2: memref<8x16xf32, #tpu.memory_space<vmem>>, %arg3: memref<296x128xf32, #tpu.memory_space<vmem>>, %arg4: memref<8x128xf32, #tpu.memory_space<vmem>>) attributes {dimension_semantics = [], scalar_prefetch = 0 : i64, scratch_operands = 0 : i64, tpu.core_type = #tpu.core_type<tc>} {
    %c0 = arith.constant 0 : index
    %c0_0 = arith.constant 0 : index
    %0 = vector.load %arg0[%c0, %c0_0] : memref<8x6xf32, #tpu.memory_space<vmem>>, vector<8x6xf32>
    %c0_1 = arith.constant 0 : index
    %c0_2 = arith.constant 0 : index
    %1 = vector.load %arg3[%c0_1, %c0_2] : memref<296x128xf32, #tpu.memory_space<vmem>>, vector<6x128xf32>
    %cst = arith.constant dense<0.000000e+00> : vector<8x128xf32>
    %2 = tpu.matmul %0, %1, %cst {dimension_numbers = #tpu.dot_dimension_numbers<[1], [0], [0], [1], [0, 0, 1, 1], [], []>} : vector<8x6xf32>, vector<6x128xf32>, vector<8x128xf32> -> vector<8x128xf32>
    %c0_3 = arith.constant 0 : index
    %c0_4 = arith.constant 0 : index
    %3 = vector.load %arg1[%c0_3, %c0_4] : memref<8x128xf32, #tpu.memory_space<vmem>>, vector<8x128xf32>
    %c8 = arith.constant 8 : index
    %c0_5 = arith.constant 0 : index
    %4 = vector.load %arg3[%c8, %c0_5] : memref<296x128xf32, #tpu.memory_space<vmem>>, vector<128x128xf32>
    %cst_6 = arith.constant dense<0.000000e+00> : vector<8x128xf32>
    %5 = tpu.matmul %3, %4, %cst_6 {dimension_numbers = #tpu.dot_dimension_numbers<[1], [0], [0], [1], [0, 0, 1, 1], [], []>} : vector<8x128xf32>, vector<128x128xf32>, vector<8x128xf32> -> vector<8x128xf32>
    %6 = arith.addf %2, %5 : vector<8x128xf32>
    %c0_7 = arith.constant 0 : index
    %c0_8 = arith.constant 0 : index
    %7 = vector.load %arg2[%c0_7, %c0_8] : memref<8x16xf32, #tpu.memory_space<vmem>>, vector<8x16xf32>
    %c136 = arith.constant 136 : index
    %c0_9 = arith.constant 0 : index
    %8 = vector.load %arg3[%c136, %c0_9] : memref<296x128xf32, #tpu.memory_space<vmem>>, vector<16x128xf32>
    %cst_10 = arith.constant dense<0.000000e+00> : vector<8x128xf32>
    %9 = tpu.matmul %7, %8, %cst_10 {dimension_numbers = #tpu.dot_dimension_numbers<[1], [0], [0], [1], [0, 0, 1, 1], [], []>} : vector<8x16xf32>, vector<16x128xf32>, vector<8x128xf32> -> vector<8x128xf32>
    %10 = arith.addf %6, %9 : vector<8x128xf32>
    %c152 = arith.constant 152 : index
    %c0_11 = arith.constant 0 : index
    %11 = vector.load %arg3[%c152, %c0_11] : memref<296x128xf32, #tpu.memory_space<vmem>>, vector<1x128xf32>
    %12 = vector.broadcast %11 : vector<1x128xf32> to vector<8x128xf32>
    %13 = arith.addf %10, %12 : vector<8x128xf32>
    %c160 = arith.constant 160 : index
    %c0_12 = arith.constant 0 : index
    %14 = vector.load %arg3[%c160, %c0_12] : memref<296x128xf32, #tpu.memory_space<vmem>>, vector<128x128xf32>
    %cst_13 = arith.constant dense<0.000000e+00> : vector<8x128xf32>
    %15 = tpu.matmul %13, %14, %cst_13 {dimension_numbers = #tpu.dot_dimension_numbers<[1], [0], [0], [1], [0, 0, 1, 1], [], []>} : vector<8x128xf32>, vector<128x128xf32>, vector<8x128xf32> -> vector<8x128xf32>
    %c288 = arith.constant 288 : index
    %c0_14 = arith.constant 0 : index
    %16 = vector.load %arg3[%c288, %c0_14] : memref<296x128xf32, #tpu.memory_space<vmem>>, vector<1x128xf32>
    %17 = vector.broadcast %16 : vector<1x128xf32> to vector<8x128xf32>
    %18 = arith.addf %15, %17 : vector<8x128xf32>
    %cst_15 = arith.constant dense<0xFF800000> : vector<128xf32>
    %19 = vector.multi_reduction <maximumf>, %18, %cst_15 [0] : vector<8x128xf32> to vector<128xf32>
    %20 = vector.shape_cast %19 : vector<128xf32> to vector<1x128xf32>
    %21 = vector.broadcast %20 : vector<1x128xf32> to vector<8x128xf32>
    %22 = arith.subf %18, %21 : vector<8x128xf32>
    %23 = math.exp %22 : vector<8x128xf32>
    %cst_16 = arith.constant dense<0.000000e+00> : vector<128xf32>
    %24 = vector.multi_reduction <add>, %23, %cst_16 [0] : vector<8x128xf32> to vector<128xf32>
    %25 = vector.shape_cast %24 : vector<128xf32> to vector<1x128xf32>
    %26 = tpu.reciprocal %25 {approx = true} : vector<1x128xf32> -> vector<1x128xf32>
    %27 = arith.mulf %25, %26 : vector<1x128xf32>
    %cst_17 = arith.constant 2.000000e+00 : f32
    %28 = vector.broadcast %cst_17 : f32 to vector<1x128xf32>
    %29 = arith.subf %28, %27 : vector<1x128xf32>
    %30 = arith.mulf %26, %29 : vector<1x128xf32>
    %31 = vector.broadcast %30 : vector<1x128xf32> to vector<8x128xf32>
    %32 = arith.mulf %23, %31 : vector<8x128xf32>
    %cst_18 = arith.constant 0.000000e+00 : f32
    %33 = vector.broadcast %cst_18 : f32 to vector<8x128xf32>
    %34 = arith.subf %33, %18 : vector<8x128xf32>
    %35 = math.exp %34 : vector<8x128xf32>
    %cst_19 = arith.constant 1.000000e+00 : f32
    %36 = vector.broadcast %cst_19 : f32 to vector<8x128xf32>
    %37 = arith.addf %36, %35 : vector<8x128xf32>
    %38 = tpu.reciprocal %37 {approx = true} : vector<8x128xf32> -> vector<8x128xf32>
    %39 = arith.mulf %37, %38 : vector<8x128xf32>
    %cst_20 = arith.constant 2.000000e+00 : f32
    %40 = vector.broadcast %cst_20 : f32 to vector<8x128xf32>
    %41 = arith.subf %40, %39 : vector<8x128xf32>
    %42 = arith.mulf %38, %41 : vector<8x128xf32>
    %43 = tpu.iota {dimensions = array<i32: 1>} : vector<8x128xi32>
    %c6_i32 = arith.constant 6 : i32
    %44 = vector.broadcast %c6_i32 : i32 to vector<8x128xi32>
    %45 = arith.cmpi slt, %43, %44 : vector<8x128xi32>
    %46 = arith.select %45, %32, %42 : vector<8x128xi1>, vector<8x128xf32>
    %c0_21 = arith.constant 0 : index
    %c0_22 = arith.constant 0 : index
    %47 = vector.load %arg4[%c0_21, %c0_22] : memref<8x128xf32, #tpu.memory_space<vmem>>, vector<8x128xf32>
    tpu.vector_store %arg4[%c0_21, %c0_22], %46 {strides = array<i32>} : memref<8x128xf32, #tpu.memory_space<vmem>>, vector<8x128xf32>,
    return
  }
}

</mosaic_0001>

<bundles_post_ra>
// kernel: net_forward.1
= control target key start
LH: loop header
LB: loop body
LE: loop exit
PB: predicated region body
PF: predicated region fallthrough
CT: control target
= control target key end

     0   :  { %9 = vsyncpa [#allocation3], 0  ;;  %s900_s0 = inlined_call_operand.hbm [shape: f32[8,6], index: 0, kind: input, shape index: {}]   ;;  %s901_s1 = inlined_call_operand.hbm [shape: f32[8,128], index: 1, kind: input, shape index: {}]   ;;  %s902_s2 = inlined_call_operand.hbm [shape: f32[8,16], index: 2, kind: input, shape index: {}]   ;;  %s903_s3 = inlined_call_operand.hbm [shape: f32[296,128], index: 3, kind: input, shape index: {}]   ;;  %s904_s4 = inlined_call_operand.hbm [shape: f32[8,128], index: 4, kind: output, shape index: {}]  }
   0x1   :  { %10 = vsyncpa [#allocation6], 0 }
   0x2   :  { %11 = vsyncpa [#allocation9], 0 }
   0x3   :  { %12 = vsyncpa [#allocation4], 0  ;;  %s772_s15 = smov [#allocation5]   ;;  %s773_s17 = smov [#allocation2]  }
   0x4   :  { %s29_s16 = sshll.u32 %s772_s15, 4  ;;  %s19_s18 = sshll.u32 %s773_s17, 4  ;;  %s30_s16 = int_to_ptr.vmem [resolvable:$true] %s29_s16  ;;  %s20_s18 = int_to_ptr.vmem [resolvable:$true] %s19_s18 }
   0x5   :  { %s654_s21 = scalar_lea.hbm %s901_s1, 128 }
   0x6   :  { %p655_p0 = scmp.ne.s32.totalorder %s901_s1, %s654_s21  ;;  %p658_p1 = scmp.lt.u32.totalorder %s654_s21, %s901_s1 }
   0x8   :  { %p660_p2 = pnand %p658_p1, %p655_p0 }
   0xa   :  { %663 = shalt.err (!%p660_p2)
}
   0xb   :  { %s664_s26 = scalar_lea.vmem %s30_s16, 128  ;;  %p669_p4 = scmp.lt.s32.totalorder %s30_s16, %s30_s16 }
   0xc   :  { %p665_p3 = scmp.ne.s32.totalorder %s30_s16, %s664_s26  ;;  %p670_p5 = scmp.lt.s32.totalorder %s664_s26, %s664_s26 }
   0xe   :  { %p671_p6 = por %p670_p5, %p669_p4 }
  0x10   :  { %p672_p7 = pnand %p671_p6, %p665_p3 }
  0x12   :  { %675 = shalt.err (!%p672_p7)
}
  0x13   :  { %32 = dma.hbm_to_vmem [thread:$0]  %s901_s1, 128, %s30_s16, [#allocation6]  }
  0x14   :  { %s676_s5 = scalar_lea.hbm %s900_s0, 128 }
  0x15   :  { %p677_p8 = scmp.ne.s32.totalorder %s900_s0, %s676_s5  ;;  %p680_p9 = scmp.lt.u32.totalorder %s676_s5, %s900_s0 }
  0x17   :  { %p682_p10 = pnand %p680_p9, %p677_p8 }
  0x19   :  { %685 = shalt.err (!%p682_p10)
}
  0x1a   :  { %s686_s10 = scalar_lea.vmem %s20_s18, 128  ;;  %p691_p12 = scmp.lt.s32.totalorder %s20_s18, %s20_s18 }
  0x1b   :  { %p687_p11 = scmp.ne.s32.totalorder %s20_s18, %s686_s10  ;;  %p692_p13 = scmp.lt.s32.totalorder %s686_s10, %s686_s10 }
  0x1d   :  { %p693_p0 = por %p692_p13, %p691_p12 }
  0x1f   :  { %p694_p1 = pnand %p693_p0, %p687_p11 }
  0x21   :  { %697 = shalt.err (!%p694_p1)
}
  0x22   :  { %22 = dma.hbm_to_vmem [thread:$0]  %s900_s0, 128, %s20_s18, [#allocation3]  }
  0x23   :  { %s774_s12 = smov [#allocation7]   ;;  %s775_s14 = smov [#allocation8]  }
  0x24   :  { %s39_s13 = sshll.u32 %s774_s12, 4  ;;  %s48_s15 = sshll.u32 %s775_s14, 4  ;;  %s40_s13 = int_to_ptr.vmem [resolvable:$true] %s39_s13  ;;  %s831_s15 = int_to_ptr.vmem [resolvable:$true] %s48_s15 }
  0x25   :  { %s698_s19 = scalar_lea.hbm %s902_s2, 128 }
  0x26   :  { %p699_p2 = scmp.ne.s32.totalorder %s902_s2, %s698_s19  ;;  %p702_p3 = scmp.lt.u32.totalorder %s698_s19, %s902_s2 }
  0x28   :  { %p704_p4 = pnand %p702_p3, %p699_p2 }
  0x2a   :  { %707 = shalt.err (!%p704_p4)
}
  0x2b   :  { %s708_s0 = scalar_lea.vmem %s40_s13, 128  ;;  %p713_p6 = scmp.lt.s32.totalorder %s40_s13, %s40_s13 }
  0x2c   :  { %p709_p5 = scmp.ne.s32.totalorder %s40_s13, %s708_s0  ;;  %p714_p7 = scmp.lt.s32.totalorder %s708_s0, %s708_s0 }
  0x2e   :  { %p715_p8 = por %p714_p7, %p713_p6 }
  0x30   :  { %p716_p9 = pnand %p715_p8, %p709_p5 }
  0x32   :  { %719 = shalt.err (!%p716_p9)
}
  0x33   :  { %42 = dma.hbm_to_vmem [thread:$0]  %s902_s2, 128, %s40_s13, [#allocation6]  }
  0x34   :  { %s720_s27 = scalar_lea.hbm %s903_s3, 4736 }
  0x35   :  { %p721_p10 = scmp.ne.s32.totalorder %s903_s3, %s720_s27  ;;  %p724_p11 = scmp.lt.u32.totalorder %s720_s27, %s903_s3 }
  0x37   :  { %p726_p12 = pnand %p724_p11, %p721_p10 }
  0x39   :  { %729 = shalt.err (!%p726_p12)
}
  0x3a   :  { %s730_s6 = scalar_lea.vmem %s831_s15, 4736  ;;  %p735_p0 = scmp.lt.s32.totalorder %s831_s15, %s831_s15 }
  0x3b   :  { %p731_p13 = scmp.ne.s32.totalorder %s831_s15, %s730_s6  ;;  %p736_p1 = scmp.lt.s32.totalorder %s730_s6, %s730_s6 }
  0x3d   :  { %p737_p2 = por %p736_p1, %p735_p0 }
  0x3f   :  { %p738_p3 = pnand %p737_p2, %p731_p13 }
  0x41   :  { %741 = shalt.err (!%p738_p3)
}
  0x42   :  { %s776_s2 = smov 128   ;;  %s777_s7 = smov 8  }
  0x43   :  { %54 = dma.hbm_to_vmem [thread:$0]  %s903_s3, 4736, %s831_s15, [#allocation9], %s776_s2, %s776_s2, %s777_s7  }
  0x44   :  { %764 = dma.done.wait [#allocation3], 128  }
  0x45   :  { %765 = vsyncadd [#allocation3], 4294967168 }
  0x46   :  { %766 = dma.done.wait [#allocation6], 256  }
  0x47   :  { %767 = vsyncadd [#allocation6], 4294967040 }
  0x48   :  { %768 = dma.done.wait [#allocation9], 4736  }
  0x49   :  { %769 = vsyncadd [#allocation9], 4294962560  ;;  %v778_v0 = vmov 0.0|0.0   ;;  %vm779_vm0 = vmmov 0   ;;  %v780_v1 = vmov 0.0   ;;  %v70_v2 = vld [vmem:[#allocation8 + $0x8] sm:$0xff] }
  0x4a   :  { %585 = vmatprep.subr.bf16.mxu0 %v778_v0  ;;  %535 = vmatprep.mubr.msk.f32.mxu0 %vm779_vm0, %v780_v1  ;;  %v71_v3 = vld [vmem:[#allocation8 + $0x10] sm:$0xff]  ;;  %v72_v4 = vld [vmem:[#allocation8 + $0x18] sm:$0xff]  ;;  %v73_v6 = vld [vmem:[#allocation8 + $0x20] sm:$0xff]  ;;  %vm237_vm1 = vcmask 130048   ;;  %vm160_vm2 = vcmask 1045504   ;;  %vm156_vm3 = vcmask 48128  }
  0x4b   :  { %609 = vmatprep.subr.bf16.mxu1 %v778_v0  ;;  %547 = vmatprep.mubr.msk.f32.mxu1 %vm779_vm0, %v780_v1  ;;  %v586_v5 = vpack.c.bf16 %v71_v3, %v70_v2  ;;  %v589_v7 = vpack.c.bf16 %v73_v6, %v72_v4  ;;  %v74_v8 = vld [vmem:[#allocation8 + $0x28] sm:$0xff]  ;;  %v75_v9 = vld [vmem:[#allocation8 + $0x30] sm:$0xff]  ;;  %v318_v14 = vld [vmem:[#allocation8 + $0xa0] sm:$0xff]  ;;  %s781_s3 = smov [#allocation10]  }
  0x4c   :  { %v235_v10 = vld [vmem:[#allocation8 + $0x88] sm:$0xff]  ;;  %v236_v11 = vld [vmem:[#allocation8 + $0x90] sm:$0xff]  ;;  %v592_v12 = vpack.c.bf16 %v75_v9, %v74_v8  ;;  %v76_v16 = vld [vmem:[#allocation8 + $0x38] sm:$0xff]  ;;  %s448_s10 = sshll.u32 %s781_s3, 4  ;;  %s449_s10 = int_to_ptr.vmem [resolvable:$true] %s448_s10 }
  0x4d   :  { %587 = vmatpush3.bf16.msra.mxu0 %v586_v5  ;;  %v610_v13 = vpack.c.bf16 %v236_v11, %v235_v10  ;;  %v319_v15 = vld [vmem:[#allocation8 + $0xa8] sm:$0xff]  ;;  %v77_v17 = vld [vmem:[#allocation8 + $0x40] sm:$0xff]  ;;  %v234_v18 = vld [vmem:[#allocation7] sm:$0xff]  ;;  %s742_s1 = scalar_lea.vmem %s449_s10, 128  ;;  %p747_p5 = scmp.lt.s32.totalorder %s449_s10, %s449_s10 }
  0x4e   :  { %588 = vmatprep.subr.bf16.mxu0 %v778_v0  ;;  %v613_v19 = vpack.c.bf16 %v319_v15, %v318_v14  ;;  %v320_v20 = vld [vmem:[#allocation8 + $0xb0] sm:$0xff]  ;;  %v321_v21 = vld [vmem:[#allocation8 + $0xb8] sm:$0xff]  ;;  %v595_v22 = vpack.c.bf16 %v77_v17, %v76_v16  ;;  %v78_v23 = vld [vmem:[#allocation8 + $0x48] sm:$0xff]  ;;  %p743_p4 = scmp.ne.s32.totalorder %s449_s10, %s742_s1  ;;  %p748_p6 = scmp.lt.s32.totalorder %s742_s1, %s742_s1 }
  0x4f   :  { %611 = vmatpush3.bf16.msra.mxu1 %v610_v13  ;;  %v79_v24 = vld [vmem:[#allocation8 + $0x50] sm:$0xff]  ;;  %v616_v25 = vpack.c.bf16 %v321_v21, %v320_v20  ;;  %v322_v26 = vld [vmem:[#allocation8 + $0xc0] sm:$0xff]  ;;  %v323_v27 = vld [vmem:[#allocation8 + $0xc8] sm:$0xff] }
  0x50   :  { %612 = vmatprep.subr.bf16.mxu1 %v778_v0  ;;  %v598_v28 = vpack.c.bf16 %v79_v24, %v78_v23  ;;  %v80_v29 = vld [vmem:[#allocation8 + $0x58] sm:$0xff]  ;;  %v81_v30 = vld [vmem:[#allocation8 + $0x60] sm:$0xff]  ;;  %v619_v31 = vpack.c.bf16 %v323_v27, %v322_v26  ;;  %v324_v32 = vld [vmem:[#allocation8 + $0xd0] sm:$0xff]  ;;  %v437_v27 = vlaneseq  ;;  %p749_p7 = por %p748_p6, %p747_p5 }
  0x51   :  { %590 = vmatpush3.bf16.msra.mxu0 %v589_v7  ;;  %v325_v33 = vld [vmem:[#allocation8 + $0xd8] sm:$0xff]  ;;  %v601_v34 = vpack.c.bf16 %v81_v30, %v80_v29  ;;  %v82_v35 = vld [vmem:[#allocation8 + $0x68] sm:$0xff]  ;;  %v83_v36 = vld [vmem:[#allocation8 + $0x70] sm:$0xff] }
  0x52   :  { %591 = vmatprep.subr.bf16.mxu0 %v778_v0  ;;  %548 = vmatmul.mubr.msk.f32.vlgmr.msra.gmra.mrb[0].mxu1 %vm237_vm1, %v234_v18  ;;  %v622_v37 = vpack.c.bf16 %v325_v33, %v324_v32  ;;  %v326_v38 = vld [vmem:[#allocation8 + $0xe0] sm:$0xff]  ;;  %v327_v39 = vld [vmem:[#allocation8 + $0xe8] sm:$0xff]  ;;  %v604_v40 = vpack.c.bf16 %v83_v36, %v82_v35  ;;  %v84_v41 = vld [vmem:[#allocation8 + $0x78] sm:$0xff]  ;;  %p750_p8 = pnand %p749_p7, %p743_p4 }
  0x53   :  { %614 = vmatpush3.bf16.msra.mxu1 %v613_v19  ;;  %582 = vmatprep.mubr.msk.f32.mxu1 %vm779_vm0, %v780_v1  ;;  %v85_v42 = vld [vmem:[#allocation8 + $0x80] sm:$0xff]  ;;  %v625_v43 = vpack.c.bf16 %v327_v39, %v326_v38  ;;  %v69_v45 = vld [vmem:[#allocation5] sm:$0xff]  ;;  %v67_v47 = vld [vmem:[#allocation2] sm:$0xff] }
  0x54   :  { %615 = vmatprep.subr.bf16.mxu1 %v778_v0  ;;  %v607_v44 = vpack.c.bf16 %v85_v42, %v84_v41  ;;  %v68_v46 = vld [vmem:[#allocation8] sm:$0x3f]  ;;  %v328_v48 = vld [vmem:[#allocation8 + $0xf0] sm:$0xff]  ;;  %v329_v49 = vld [vmem:[#allocation8 + $0xf8] sm:$0xff] }
  0x55   :  { %593 = vmatpush3.bf16.msra.mxu0 %v592_v12  ;;  %v628_v50 = vpack.c.bf16 %v329_v49, %v328_v48  ;;  %v330_v51 = vld [vmem:[#allocation8 + $0x100] sm:$0xff]  ;;  %v331_v52 = vld [vmem:[#allocation8 + $0x108] sm:$0xff]  ;;  %v332_v54 = vld [vmem:[#allocation8 + $0x110] sm:$0xff] }
  0x56   :  { %594 = vmatprep.subr.bf16.mxu0 %v778_v0  ;;  %v631_v53 = vpack.c.bf16 %v331_v52, %v330_v51  ;;  %v333_v55 = vld [vmem:[#allocation8 + $0x118] sm:$0xff]  ;;  %v463_v4 = vld [vmem:[#allocation8 + $0x120] ss:$0 sm:$0xff] }
  0x57   :  { %617 = vmatpush3.bf16.msra.mxu1 %v616_v25  ;;  %v634_v56 = vpack.c.bf16 %v333_v55, %v332_v54 }
  0x58   :  { %618 = vmatprep.subr.bf16.mxu1 %v778_v0 }
  0x59   :  { %596 = vmatpush3.bf16.msra.mxu0 %v595_v22 }
  0x5a   :  { %597 = vmatprep.subr.bf16.mxu0 %v778_v0 }
  0x5b   :  { %620 = vmatpush3.bf16.msra.mxu1 %v619_v31  ;;  %v438_v31 = vand.u32 127, %v437_v27 }
  0x5c   :  { %621 = vmatprep.subr.bf16.mxu1 %v778_v0 }
  0x5d   :  { %599 = vmatpush3.bf16.msra.mxu0 %v598_v28  ;;  %vm439_vm4 = vcmp.lt.s32.totalorder %v438_v31, 6 }
  0x5e   :  { %600 = vmatprep.subr.bf16.mxu0 %v778_v0 }
  0x5f   :  { %623 = vmatpush3.bf16.msra.mxu1 %v622_v37 }
  0x60   :  { %624 = vmatprep.subr.bf16.mxu1 %v778_v0 }
  0x61   :  { %602 = vmatpush3.bf16.msra.mxu0 %v601_v34 }
  0x62   :  { %603 = vmatprep.subr.bf16.mxu0 %v778_v0 }
  0x63   :  { %626 = vmatpush3.bf16.msra.mxu1 %v625_v43 }
  0x64   :  { %627 = vmatprep.subr.bf16.mxu1 %v778_v0 }
  0x65   :  { %605 = vmatpush3.bf16.msra.mxu0 %v604_v40 }
  0x66   :  { %606 = vmatprep.subr.bf16.mxu0 %v778_v0 }
  0x67   :  { %629 = vmatpush3.bf16.msra.mxu1 %v628_v50 }
  0x68   :  { %630 = vmatprep.subr.bf16.mxu1 %v778_v0 }
  0x69   :  { %608 = vmatpush3.bf16.msra.mxu0 %v607_v44 }
  0x6a   :  { %538 = vmatprep.subr.mxu0 %v780_v1 }
  0x6b   :  { %632 = vmatpush3.bf16.msra.mxu1 %v631_v53 }
  0x6c   :  { %536 = vmatmul.mubr.f32.vlgmr.msra.gmra.mrb[0].mxu0 %v69_v45  ;;  %633 = vmatprep.subr.bf16.mxu1 %v778_v0 }
  0x6d   :  { %539 = vmatpush3.msk.msra.mxu0 %vm160_vm2, %v68_v46  ;;  %540 = vmatprep.mubr.msk.f32.mxu0 %vm779_vm0, %v780_v1  ;;  %v462_v1 = vld [vmem:[#allocation8 + $0x98] ss:$0 sm:$0xff] }
  0x6f   :  { %635 = vmatpush3.bf16.msra.mxu1 %v634_v56 }
  0x70   :  { %541 = vmatmul.mubr.msk.f32.vlgmr.msra.gmra.mrb[2].mxu0 %vm156_vm3, %v67_v47 }
 0x125   :  { %v307_v57 = vpop.f32.mrb[0].mxu1 }
 0x126   :  { %v549_v58 = vpop.f32.mrb[1].mxu1 }
 0x13f   :  { %v152_v59 = vpop.f32.mrb[0].mxu0 }
 0x140   :  { %v537_v60 = vpop.f32.mrb[1].mxu0 }
 0x143   :  { %v230_v61 = vpop.f32.mrb[2].mxu0 }
 0x144   :  { %v231_v62 = vadd.f32 %v230_v61, %v152_v59  ;;  %v542_v63 = vpop.f32.mrb[3].mxu0 }
 0x146   :  { %v311_v2 = vadd.f32 %v307_v57, %v231_v62 }
 0x148   :  { %v317_v3 = vadd.f32 %v462_v1, %v311_v2 }
 0x14a   :  { %583 = vmatmul.mubr.f32.vlgmr.msra.gmra.mrb[2].mxu1 %v317_v3 }
 0x21d   :  { %v405_v5 = vpop.f32.mrb[2].mxu1 }
 0x21e   :  { %v406_v6 = vadd.f32 %v463_v4, %v405_v5  ;;  %v584_v7 = vpop.f32.mrb[3].mxu1 }
 0x220   :  { %v409_v0 = vrot.slane %v406_v6, 4  ;;  %v429_v13 = vsub.f32 0.0, %v406_v6 }
 0x222   :  { %v410_v8 = vmax.f32 %v406_v6, %v409_v0  ;;  %v430_v16 = vmul.f32 1.442695, %v429_v13 }
 0x224   :  { %v411_v9 = vrot.slane %v410_v8, 2 }
 0x226   :  { %v412_v10 = vmax.f32 %v410_v8, %v411_v9 }
 0x228   :  { %v413_v11 = vrot.slane %v412_v10, 1 }
 0x22a   :  { %v414_v12 = vmax.f32 %v412_v10, %v413_v11 }
 0x22c   :  { %v415_v14 = vsub.f32 %v406_v6, %v414_v12 }
 0x22e   :  { %v416_v15 = vmul.f32 1.442695, %v415_v14 }
 0x230   :  { %646 = vpow2.f32 %v416_v15 }
 0x231   :  { %648 = vpow2.f32 %v430_v16 }
 0x23a   :  { %v647_v17 = vpop.eup %646 }
 0x23b   :  { %v418_v18 = vrot.slane %v647_v17, 4  ;;  %v649_v19 = vpop.eup %648 }
 0x23c   :  { %v432_v22 = vadd.f32 1.0, %v649_v19 }
 0x23d   :  { %v419_v20 = vadd.f32 %v647_v17, %v418_v18 }
 0x23e   :  { %650 = vrcp.f32 %v432_v22 }
 0x23f   :  { %v420_v21 = vrot.slane %v419_v20, 2 }
 0x241   :  { %v421_v23 = vadd.f32 %v420_v21, %v419_v20 }
 0x243   :  { %v422_v24 = vrot.slane %v421_v23, 1 }
 0x245   :  { %v423_v25 = vadd.f32 %v422_v24, %v421_v23 }
 0x247   :  { %652 = vrcp.f32 %v423_v25 }
 0x248   :  { %v651_v26 = vpop.eup %650 }
 0x249   :  { %v434_v28 = vmul.f32 %v651_v26, %v432_v22 }
 0x24b   :  { %v435_v33 = vsub.f32 2.0, %v434_v28 }
 0x24d   :  { %v436_v36 = vmul.f32 %v651_v26, %v435_v33 }
 0x251   :  { %v653_v29 = vpop.eup %652 }
 0x252   :  { %v425_v30 = vmul.f32 %v653_v29, %v423_v25 }
 0x254   :  { %v426_v32 = vsub.f32 2.0, %v425_v30 }
 0x256   :  { %v427_v34 = vmul.f32 %v653_v29, %v426_v32 }
 0x258   :  { %v428_v35 = vmul.f32 %v647_v17, %v427_v34 }
 0x25a   :  { %v440_v37 = vsel %vm439_vm4, %v428_v35, %v436_v36 }
 0x25b   :  { %441 = vst [vmem:[#allocation10] sm:$0xff] %v440_v37 }
 0x25c   :  { %753 = shalt.err (!%p750_p8)
}
 0x25d   :  { %s754_s13 = scalar_lea.hbm %s904_s4, 128 }
 0x25e   :  { %p755_p9 = scmp.ne.s32.totalorder %s904_s4, %s754_s13  ;;  %p758_p10 = scmp.lt.u32.totalorder %s754_s13, %s904_s4 }
 0x260   :  { %p760_p11 = pnand %p758_p10, %p755_p9 }
 0x262   :  { %763 = shalt.err (!%p760_p11)
}
 0x263   :  { %451 = dma.vmem_to_hbm [thread:$0]  %s449_s10, 128, %s904_s4, [#allocation4]  }
 0x264   :  { %770 = dma.done.wait [#allocation4], 128  }
 0x265   :  { %771 = vsyncadd [#allocation4], 4294967168 }
 0x266   :  { %455 = vsyncpa [#allocation3], 1 }
 0x267   :  { %456 = vsyncpa [#allocation6], 1 }
 0x268   :  { %457 = vsyncpa [#allocation9], 1 }
 0x269   :  { %458 = vsyncpa [#allocation4], 1 }

</bundles_post_ra>
